<compile_context>
chip_gen: v7x
topology: tpu7x:2x2x1
jax: 0.10.0
libtpu: 0.0.40
codegen_flags: <defaults>
</compile_context>

<pallas_src>
import numpy as np
import jax
import jax.numpy as jnp
from jax.experimental import pallas as pl
from jax.experimental.pallas import tpu as pltpu


LANE = 128     # vreg lane width  -> last-dim padding target
SUBLANE = 8    # vreg sublane width -> row padding target


def _round_up(n, m):
    return ((n + m - 1) // m) * m


# ------------------------------ Pallas kernel -------------------------------

def _fnn_kernel(x_ref, w1_ref, b1_ref, w2_ref, b2_ref, w3_ref, b3_ref,
                w4_ref, b4_ref, o_ref):
    """Fused fc1+ReLU -> fc2+ReLU -> fc3+ReLU -> fc4 on one row-tile of x.

    MXU operands are bf16, accumulation is f32; bias/ReLU epilogues stay f32.
    Padded columns are zero in the weights and biases, so they remain exactly
    zero through every layer and never pollute the real outputs.
    """
    # fc1 + ReLU
    h = jnp.dot(x_ref[...], w1_ref[...], preferred_element_type=jnp.float32)
    h = jnp.maximum(h + b1_ref[...], 0.0)
    # fc2 + ReLU   (dropout == identity at inference)
    h = jnp.dot(h.astype(w2_ref.dtype), w2_ref[...],
                preferred_element_type=jnp.float32)
    h = jnp.maximum(h + b2_ref[...], 0.0)
    # fc3 + ReLU
    h = jnp.dot(h.astype(w3_ref.dtype), w3_ref[...],
                preferred_element_type=jnp.float32)
    h = jnp.maximum(h + b3_ref[...], 0.0)
    # fc4 (no activation)
    h = jnp.dot(h.astype(w4_ref.dtype), w4_ref[...],
                preferred_element_type=jnp.float32)
    o_ref[...] = (h + b4_ref[...]).astype(o_ref.dtype)


# ------------------------------ host wrappers --------------------------------

def _pad2d(a, rows, cols, dtype):
    r, c = a.shape
    return jnp.zeros((rows, cols), dtype).at[:r, :c].set(a.astype(dtype))


def pack_params(p):
    """One-time prep: transpose nn.Linear-style (out,in) weights to (in,out),
    zero-pad every matmul dim to a multiple of 128 (lane-dense), cast MXU
    operands to bf16; biases stay f32 as (1, N_pad) rows."""
    d_in = p['fc1_w'].shape[1]
    sizes = [d_in] + [p[f'fc{i}_w'].shape[0] for i in (1, 2, 3, 4)]
    padded = [_round_up(s, LANE) for s in sizes]
    packed = {'dims': (sizes, padded)}
    for i in (1, 2, 3, 4):
        w = p[f'fc{i}_w'].T                       # (in, out)
        b = p[f'fc{i}_b'].reshape(1, -1)
        packed[f'w{i}'] = _pad2d(w, padded[i - 1], padded[i], jnp.bfloat16)
        packed[f'b{i}'] = _pad2d(b, 1, padded[i], jnp.float32)
    return packed


def fnn_forward(x, packed):
    """x: (B, ...) -> logits (B, output_size).  Whole forward = 1 pallas_call."""
    sizes, padded = packed['dims']
    D, Dp = sizes[0], padded[0]
    H1p, H2p, H3p, Np = padded[1], padded[2], padded[3], padded[4]

    B = x.shape[0]
    xf = x.reshape(B, -1)                         # torch.flatten(x, start_dim=1)
    assert xf.shape[1] == D, (xf.shape, D)

    # Row tiling: keep >= 8 sublanes, tile at 256 rows for large batches.
    tm = min(_round_up(max(B, SUBLANE), SUBLANE), 256)
    Mp = _round_up(max(B, tm), tm)
    xp = jnp.zeros((Mp, Dp), jnp.bfloat16).at[:B, :D].set(xf.astype(jnp.bfloat16))

    def const(shape):                              # weights resident across grid
        return pl.BlockSpec(shape, lambda i: (0, 0))

    out = pl.pallas_call(
        _fnn_kernel,
        out_shape=jax.ShapeDtypeStruct((Mp, Np), jnp.float32),
        grid=(Mp // tm,),
        in_specs=[
            pl.BlockSpec((tm, Dp), lambda i: (i, 0)),   # x row-tile
            const((Dp, H1p)), const((1, H1p)),          # fc1
            const((H1p, H2p)), const((1, H2p)),         # fc2
            const((H2p, H3p)), const((1, H3p)),         # fc3
            const((H3p, Np)), const((1, Np)),           # fc4
        ],
        out_specs=pl.BlockSpec((tm, Np), lambda i: (i, 0)),
        compiler_params=pltpu.CompilerParams(
            dimension_semantics=("parallel",)),         # v7x: 2 TCs split rows
    )(xp, packed['w1'], packed['b1'], packed['w2'], packed['b2'],
      packed['w3'], packed['b3'], packed['w4'], packed['b4'])

    return out[:B, :sizes[4]]


# --------------------------- params / reference -----------------------------

def init_params(key, input_shape, output_size,
                hidden_size1=512, hidden_size2=256, hidden_size3=64):
    """nn.Linear-style params (w: (out,in), b: (out,)), torch default init."""
    d_in = input_shape[1] * input_shape[2]
    dims = [d_in, hidden_size1, hidden_size2, hidden_size3, output_size]
    keys = jax.random.split(key, 8)
    p = {}
    for i in range(4):
        bound = 1.0 / np.sqrt(dims[i])
        p[f'fc{i + 1}_w'] = jax.random.uniform(
            keys[2 * i], (dims[i + 1], dims[i]), jnp.float32, -bound, bound)
        p[f'fc{i + 1}_b'] = jax.random.uniform(
            keys[2 * i + 1], (dims[i + 1],), jnp.float32, -bound, bound)
    return p


def reference_forward(x, p):
    """Pure-JAX f32 reference (eval mode: dropout = identity)."""
    y = x.reshape(x.shape[0], -1)
    y = jnp.maximum(y @ p['fc1_w'].T + p['fc1_b'], 0.0)
    y = jnp.maximum(y @ p['fc2_w'].T + p['fc2_b'], 0.0)
    y = jnp.maximum(y @ p['fc3_w'].T + p['fc3_b'], 0.0)
    return y @ p['fc4_w'].T + p['fc4_b']


# ---------------------------------- main -------------------------------------

if __name__ == "__main__":
    B = 2
    input_shape = (1, 16, 16)          # (channels, H, W); fc1 in = 16*16 = 256
    output_size = 10

    key = jax.random.PRNGKey(0)
    kx, kp = jax.random.split(key)
    x = jax.random.normal(kx, (B,) + input_shape, jnp.float32)

    params = init_params(kp, input_shape, output_size)
    packed = pack_params(params)

    out = jax.block_until_ready(fnn_forward(x, packed))
    assert out.shape == (B, output_size), out.shape

    ref = jax.block_until_ready(reference_forward(x, params))
    max_err = float(np.max(np.abs(np.asarray(out) - np.asarray(ref))))
    assert np.allclose(np.asarray(out), np.asarray(ref),
                       atol=5e-2, rtol=5e-2), max_err

    print("KERNEL_OK")
</pallas_src>

<mosaic_0001>
module attributes {stable_mosaic.version = 11 : i64} {
  func.func @_fnn_kernel(%arg0: i32, %arg1: memref<8x256xbf16, #tpu.memory_space<vmem>>, %arg2: memref<256x512xbf16, #tpu.memory_space<vmem>>, %arg3: memref<1x512xf32, #tpu.memory_space<vmem>>, %arg4: memref<512x256xbf16, #tpu.memory_space<vmem>>, %arg5: memref<1x256xf32, #tpu.memory_space<vmem>>, %arg6: memref<256x128xbf16, #tpu.memory_space<vmem>>, %arg7: memref<1x128xf32, #tpu.memory_space<vmem>>, %arg8: memref<128x128xbf16, #tpu.memory_space<vmem>>, %arg9: memref<1x128xf32, #tpu.memory_space<vmem>>, %arg10: memref<8x128xf32, #tpu.memory_space<vmem>>) attributes {dimension_semantics = [#tpu.dimension_semantics<parallel>], iteration_bounds = array<i64: 1>, scalar_prefetch = 0 : i64, scratch_operands = 0 : i64, tpu.core_type = #tpu.core_type<tc>, window_params = [{transform_indices = @transform_0, window_bounds = array<i64: 8, 256>}, {pipeline_mode = #tpu.pipeline_mode<synchronous>, transform_indices = @transform_1, window_bounds = array<i64: 256, 512>}, {pipeline_mode = #tpu.pipeline_mode<synchronous>, transform_indices = @transform_2, window_bounds = array<i64: 1, 512>}, {pipeline_mode = #tpu.pipeline_mode<synchronous>, transform_indices = @transform_3, window_bounds = array<i64: 512, 256>}, {pipeline_mode = #tpu.pipeline_mode<synchronous>, transform_indices = @transform_4, window_bounds = array<i64: 1, 256>}, {pipeline_mode = #tpu.pipeline_mode<synchronous>, transform_indices = @transform_5, window_bounds = array<i64: 256, 128>}, {pipeline_mode = #tpu.pipeline_mode<synchronous>, transform_indices = @transform_6, window_bounds = array<i64: 1, 128>}, {pipeline_mode = #tpu.pipeline_mode<synchronous>, transform_indices = @transform_7, window_bounds = array<i64: 128, 128>}, {pipeline_mode = #tpu.pipeline_mode<synchronous>, transform_indices = @transform_8, window_bounds = array<i64: 1, 128>}, {transform_indices = @transform_9, window_bounds = array<i64: 8, 128>}]} {
    %c0 = arith.constant 0 : index
    %c0_0 = arith.constant 0 : index
    %0 = vector.load %arg1[%c0, %c0_0] : memref<8x256xbf16, #tpu.memory_space<vmem>>, vector<8x256xbf16>
    %c0_1 = arith.constant 0 : index
    %c0_2 = arith.constant 0 : index
    %1 = vector.load %arg2[%c0_1, %c0_2] : memref<256x512xbf16, #tpu.memory_space<vmem>>, vector<256x512xbf16>
    %cst = arith.constant dense<0.000000e+00> : vector<8x512xf32>
    %2 = tpu.matmul %0, %1, %cst {dimension_numbers = #tpu.dot_dimension_numbers<[1], [0], [0], [1], [0, 0, 1, 1], [], []>} : vector<8x256xbf16>, vector<256x512xbf16>, vector<8x512xf32> -> vector<8x512xf32>
    %c0_3 = arith.constant 0 : index
    %c0_4 = arith.constant 0 : index
    %3 = vector.load %arg3[%c0_3, %c0_4] : memref<1x512xf32, #tpu.memory_space<vmem>>, vector<1x512xf32>
    %4 = vector.broadcast %3 : vector<1x512xf32> to vector<8x512xf32>
    %5 = arith.addf %2, %4 : vector<8x512xf32>
    %cst_5 = arith.constant 0.000000e+00 : f32
    %6 = vector.broadcast %cst_5 : f32 to vector<8x512xf32>
    %7 = arith.maximumf %5, %6 : vector<8x512xf32>
    %8 = arith.truncf %7 : vector<8x512xf32> to vector<8x512xbf16>
    %c0_6 = arith.constant 0 : index
    %c0_7 = arith.constant 0 : index
    %9 = vector.load %arg4[%c0_6, %c0_7] : memref<512x256xbf16, #tpu.memory_space<vmem>>, vector<512x256xbf16>
    %cst_8 = arith.constant dense<0.000000e+00> : vector<8x256xf32>
    %10 = tpu.matmul %8, %9, %cst_8 {dimension_numbers = #tpu.dot_dimension_numbers<[1], [0], [0], [1], [0, 0, 1, 1], [], []>} : vector<8x512xbf16>, vector<512x256xbf16>, vector<8x256xf32> -> vector<8x256xf32>
    %c0_9 = arith.constant 0 : index
    %c0_10 = arith.constant 0 : index
    %11 = vector.load %arg5[%c0_9, %c0_10] : memref<1x256xf32, #tpu.memory_space<vmem>>, vector<1x256xf32>
    %12 = vector.broadcast %11 : vector<1x256xf32> to vector<8x256xf32>
    %13 = arith.addf %10, %12 : vector<8x256xf32>
    %cst_11 = arith.constant 0.000000e+00 : f32
    %14 = vector.broadcast %cst_11 : f32 to vector<8x256xf32>
    %15 = arith.maximumf %13, %14 : vector<8x256xf32>
    %16 = arith.truncf %15 : vector<8x256xf32> to vector<8x256xbf16>
    %c0_12 = arith.constant 0 : index
    %c0_13 = arith.constant 0 : index
    %17 = vector.load %arg6[%c0_12, %c0_13] : memref<256x128xbf16, #tpu.memory_space<vmem>>, vector<256x128xbf16>
    %cst_14 = arith.constant dense<0.000000e+00> : vector<8x128xf32>
    %18 = tpu.matmul %16, %17, %cst_14 {dimension_numbers = #tpu.dot_dimension_numbers<[1], [0], [0], [1], [0, 0, 1, 1], [], []>} : vector<8x256xbf16>, vector<256x128xbf16>, vector<8x128xf32> -> vector<8x128xf32>
    %c0_15 = arith.constant 0 : index
    %c0_16 = arith.constant 0 : index
    %19 = vector.load %arg7[%c0_15, %c0_16] : memref<1x128xf32, #tpu.memory_space<vmem>>, vector<1x128xf32>
    %20 = vector.broadcast %19 : vector<1x128xf32> to vector<8x128xf32>
    %21 = arith.addf %18, %20 : vector<8x128xf32>
    %cst_17 = arith.constant 0.000000e+00 : f32
    %22 = vector.broadcast %cst_17 : f32 to vector<8x128xf32>
    %23 = arith.maximumf %21, %22 : vector<8x128xf32>
    %24 = arith.truncf %23 : vector<8x128xf32> to vector<8x128xbf16>
    %c0_18 = arith.constant 0 : index
    %c0_19 = arith.constant 0 : index
    %25 = vector.load %arg8[%c0_18, %c0_19] : memref<128x128xbf16, #tpu.memory_space<vmem>>, vector<128x128xbf16>
    %cst_20 = arith.constant dense<0.000000e+00> : vector<8x128xf32>
    %26 = tpu.matmul %24, %25, %cst_20 {dimension_numbers = #tpu.dot_dimension_numbers<[1], [0], [0], [1], [0, 0, 1, 1], [], []>} : vector<8x128xbf16>, vector<128x128xbf16>, vector<8x128xf32> -> vector<8x128xf32>
    %c0_21 = arith.constant 0 : index
    %c0_22 = arith.constant 0 : index
    %27 = vector.load %arg9[%c0_21, %c0_22] : memref<1x128xf32, #tpu.memory_space<vmem>>, vector<1x128xf32>
    %28 = vector.broadcast %27 : vector<1x128xf32> to vector<8x128xf32>
    %29 = arith.addf %26, %28 : vector<8x128xf32>
    %c0_23 = arith.constant 0 : index
    %c0_24 = arith.constant 0 : index
    %30 = vector.load %arg10[%c0_23, %c0_24] : memref<8x128xf32, #tpu.memory_space<vmem>>, vector<8x128xf32>
    tpu.vector_store %arg10[%c0_23, %c0_24], %29 {strides = array<i32>} : memref<8x128xf32, #tpu.memory_space<vmem>>, vector<8x128xf32>,
    return
  }
  func.func @transform_0(%arg0: i32) -> (i32, i32) {
    %c0_i32 = arith.constant 0 : i32
    %c0_i32_0 = arith.constant 0 : i32
    return %arg0, %c0_i32 : i32, i32
  }
  func.func @transform_1(%arg0: i32) -> (i32, i32) {
    %c0_i32 = arith.constant 0 : i32
    %c0_i32_0 = arith.constant 0 : i32
    %c0_i32_1 = arith.constant 0 : i32
    return %c0_i32, %c0_i32_0 : i32, i32
  }
  func.func @transform_2(%arg0: i32) -> (i32, i32) {
    %c0_i32 = arith.constant 0 : i32
    %c0_i32_0 = arith.constant 0 : i32
    %c0_i32_1 = arith.constant 0 : i32
    return %c0_i32, %c0_i32_0 : i32, i32
  }
  func.func @transform_3(%arg0: i32) -> (i32, i32) {
    %c0_i32 = arith.constant 0 : i32
    %c0_i32_0 = arith.constant 0 : i32
    %c0_i32_1 = arith.constant 0 : i32
    return %c0_i32, %c0_i32_0 : i32, i32
  }
  func.func @transform_4(%arg0: i32) -> (i32, i32) {
    %c0_i32 = arith.constant 0 : i32
    %c0_i32_0 = arith.constant 0 : i32
    %c0_i32_1 = arith.constant 0 : i32
    return %c0_i32, %c0_i32_0 : i32, i32
  }
  func.func @transform_5(%arg0: i32) -> (i32, i32) {
    %c0_i32 = arith.constant 0 : i32
    %c0_i32_0 = arith.constant 0 : i32
    %c0_i32_1 = arith.constant 0 : i32
    return %c0_i32, %c0_i32_0 : i32, i32
  }
  func.func @transform_6(%arg0: i32) -> (i32, i32) {
    %c0_i32 = arith.constant 0 : i32
    %c0_i32_0 = arith.constant 0 : i32
    %c0_i32_1 = arith.constant 0 : i32
    return %c0_i32, %c0_i32_0 : i32, i32
  }
  func.func @transform_7(%arg0: i32) -> (i32, i32) {
    %c0_i32 = arith.constant 0 : i32
    %c0_i32_0 = arith.constant 0 : i32
    %c0_i32_1 = arith.constant 0 : i32
    return %c0_i32, %c0_i32_0 : i32, i32
  }
  func.func @transform_8(%arg0: i32) -> (i32, i32) {
    %c0_i32 = arith.constant 0 : i32
    %c0_i32_0 = arith.constant 0 : i32
    %c0_i32_1 = arith.constant 0 : i32
    return %c0_i32, %c0_i32_0 : i32, i32
  }
  func.func @transform_9(%arg0: i32) -> (i32, i32) {
    %c0_i32 = arith.constant 0 : i32
    %c0_i32_0 = arith.constant 0 : i32
    return %arg0, %c0_i32 : i32, i32
  }
}

</mosaic_0001>

<bundles_post_ra>
// kernel: tpu_custom_call.1
= control target key start
LH: loop header
LB: loop body
LE: loop exit
PB: predicated region body
PF: predicated region fallthrough
CT: control target
= control target key end

     0   :  { %14 = vsyncpa [#allocation3], 0  ;;  %s2164_s0 = inlined_call_operand.hbm [shape: bf16[8,256], index: 0, kind: input, shape index: {}]   ;;  %s2165_s1 = inlined_call_operand.hbm [shape: bf16[256,512], index: 1, kind: input, shape index: {}]   ;;  %s2166_s2 = inlined_call_operand.vmem [shape: f32[1,512], index: 2, kind: input, shape index: {}]   ;;  %s2167_s3 = inlined_call_operand.hbm [shape: bf16[512,256], index: 3, kind: input, shape index: {}]   ;;  %s2168_s4 = inlined_call_operand.vmem [shape: f32[1,256], index: 4, kind: input, shape index: {}]   ;;  %s2169_s5 = inlined_call_operand.hbm [shape: bf16[256,128], index: 5, kind: input, shape index: {}]   ;;  %s2170_s6 = inlined_call_operand.vmem [shape: f32[1,128], index: 6, kind: input, shape index: {}]   ;;  %s2171_s7 = inlined_call_operand.hbm [shape: bf16[128,128], index: 7, kind: input, shape index: {}]   ;;  %s2172_s8 = inlined_call_operand.vmem [shape: f32[1,128], index: 8, kind: input, shape index: {}]   ;;  %s2173_s9 = inlined_call_operand.hbm [shape: f32[8,128], index: 9, kind: output, shape index: {}]  }
   0x1   :  { %15 = vsyncpa [#allocation6], 0 }
   0x2   :  { %16 = vsyncpa [#allocation9], 0 }
   0x3   :  { %17 = vsyncpa [#allocation4], 0  ;;  %s1977_s30 = smov [#allocation5]   ;;  %s1837_s13 = scalar_lea.hbm %s2165_s1, 8192 }
   0x4   :  { %s33_s10 = sshll.u32 %s1977_s30, 4  ;;  %p1838_p0 = scmp.ne.s32.totalorder %s2165_s1, %s1837_s13  ;;  %s34_s10 = int_to_ptr.vmem [resolvable:$true] %s33_s10 }
   0x5   :  { %p1841_p1 = scmp.lt.u32.totalorder %s1837_s13, %s2165_s1 }
   0x7   :  { %p1843_p2 = pnand %p1841_p1, %p1838_p0 }
   0x9   :  { %1846 = shalt.err (!%p1843_p2)
}
   0xa   :  { %s1847_s18 = scalar_lea.vmem %s34_s10, 8192  ;;  %p1852_p4 = scmp.lt.s32.totalorder %s34_s10, %s34_s10 }
   0xb   :  { %p1848_p3 = scmp.ne.s32.totalorder %s34_s10, %s1847_s18  ;;  %p1853_p5 = scmp.lt.s32.totalorder %s1847_s18, %s1847_s18 }
   0xd   :  { %p1854_p6 = por %p1853_p5, %p1852_p4 }
   0xf   :  { %p1855_p7 = pnand %p1854_p6, %p1848_p3 }
  0x11   :  { %1858 = shalt.err (!%p1855_p7)
}
  0x12   :  { %s1978_s19 = smov 256   ;;  %s1979_s20 = smov 16  }
  0x13   :  { %39 = dma.hbm_to_vmem [thread:$0]  %s2165_s1, 8192, %s34_s10, [#allocation6], %s1978_s19, %s1978_s19, %s1979_s20  }
  0x14   :  { %s1980_s23 = smov [#allocation8]   ;;  %s1859_s27 = scalar_lea.hbm %s2169_s5, 2048 }
  0x15   :  { %s61_s24 = sshll.u32 %s1980_s23, 4  ;;  %p1860_p8 = scmp.ne.s32.totalorder %s2169_s5, %s1859_s27  ;;  %s62_s24 = int_to_ptr.vmem [resolvable:$true] %s61_s24 }
  0x16   :  { %p1863_p9 = scmp.lt.u32.totalorder %s1859_s27, %s2169_s5 }
  0x18   :  { %p1865_p10 = pnand %p1863_p9, %p1860_p8 }
  0x1a   :  { %1868 = shalt.err (!%p1865_p10)
}
  0x1b   :  { %s1869_s12 = scalar_lea.vmem %s62_s24, 2048  ;;  %p1874_p12 = scmp.lt.s32.totalorder %s62_s24, %s62_s24 }
  0x1c   :  { %p1870_p11 = scmp.ne.s32.totalorder %s62_s24, %s1869_s12  ;;  %p1875_p13 = scmp.lt.s32.totalorder %s1869_s12, %s1869_s12 }
  0x1e   :  { %p1876_p0 = por %p1875_p13, %p1874_p12 }
  0x20   :  { %p1877_p1 = pnand %p1876_p0, %p1870_p11 }
  0x22   :  { %1880 = shalt.err (!%p1877_p1)
}
  0x23   :  { %s1981_s1 = smov 64   ;;  %s1982_s10 = smov 4  }
  0x24   :  { %67 = dma.hbm_to_vmem [thread:$0]  %s2169_s5, 2048, %s62_s24, [#allocation9], %s1981_s1, %s1981_s1, %s1982_s10  }
  0x25   :  { %s1983_s15 = smov [#allocation2]   ;;  %s1984_s17 = smov [#allocation7]  }
  0x26   :  { %s24_s16 = sshll.u32 %s1983_s15, 4  ;;  %s47_s18 = sshll.u32 %s1984_s17, 4  ;;  %s25_s16 = int_to_ptr.vmem [resolvable:$true] %s24_s16  ;;  %s2068_s18 = int_to_ptr.vmem [resolvable:$true] %s47_s18 }
  0x27   :  { %s1881_s21 = scalar_lea.hbm %s2164_s0, 128 }
  0x28   :  { %p1882_p2 = scmp.ne.s32.totalorder %s2164_s0, %s1881_s21  ;;  %p1885_p3 = scmp.lt.u32.totalorder %s1881_s21, %s2164_s0 }
  0x2a   :  { %p1887_p4 = pnand %p1885_p3, %p1882_p2 }
  0x2c   :  { %1890 = shalt.err (!%p1887_p4)
}
  0x2d   :  { %s1891_s5 = scalar_lea.vmem %s25_s16, 128  ;;  %p1896_p6 = scmp.lt.s32.totalorder %s25_s16, %s25_s16 }
  0x2e   :  { %p1892_p5 = scmp.ne.s32.totalorder %s25_s16, %s1891_s5  ;;  %p1897_p7 = scmp.lt.s32.totalorder %s1891_s5, %s1891_s5 }
  0x30   :  { %p1898_p8 = por %p1897_p7, %p1896_p6 }
  0x32   :  { %p1899_p9 = pnand %p1898_p8, %p1892_p5 }
  0x34   :  { %1902 = shalt.err (!%p1899_p9)
}
  0x35   :  { %27 = dma.hbm_to_vmem [thread:$0]  %s2164_s0, 128, %s25_s16, [#allocation3]  }
  0x36   :  { %s1903_s30 = scalar_lea.hbm %s2167_s3, 8192 }
  0x37   :  { %p1904_p10 = scmp.ne.s32.totalorder %s2167_s3, %s1903_s30  ;;  %p1907_p11 = scmp.lt.u32.totalorder %s1903_s30, %s2167_s3 }
  0x39   :  { %p1909_p12 = pnand %p1907_p11, %p1904_p10 }
  0x3b   :  { %1912 = shalt.err (!%p1909_p12)
}
  0x3c   :  { %s1913_s15 = scalar_lea.vmem %s2068_s18, 8192  ;;  %p1918_p0 = scmp.lt.s32.totalorder %s2068_s18, %s2068_s18 }
  0x3d   :  { %p1914_p13 = scmp.ne.s32.totalorder %s2068_s18, %s1913_s15  ;;  %p1919_p1 = scmp.lt.s32.totalorder %s1913_s15, %s1913_s15 }
  0x3f   :  { %p1920_p2 = por %p1919_p1, %p1918_p0 }
  0x41   :  { %p1921_p3 = pnand %p1920_p2, %p1914_p13 }
  0x43   :  { %1924 = shalt.err (!%p1921_p3)
}
  0x44   :  { %s1985_s0 = smov 128   ;;  %s1986_s16 = smov 8  }
  0x45   :  { %53 = dma.hbm_to_vmem [thread:$0]  %s2167_s3, 8192, %s2068_s18, [#allocation6], %s1985_s0, %s1985_s0, %s1986_s16  }
  0x46   :  { %s1987_s20 = smov [#allocation10]   ;;  %s1925_s25 = scalar_lea.hbm %s2171_s7, 1024 }
  0x47   :  { %s75_s21 = sshll.u32 %s1987_s20, 4  ;;  %p1926_p4 = scmp.ne.s32.totalorder %s2171_s7, %s1925_s25  ;;  %s76_s21 = int_to_ptr.vmem [resolvable:$true] %s75_s21 }
  0x48   :  { %p1929_p5 = scmp.lt.u32.totalorder %s1925_s25, %s2171_s7 }
  0x4a   :  { %p1931_p6 = pnand %p1929_p5, %p1926_p4 }
  0x4c   :  { %1934 = shalt.err (!%p1931_p6)
}
  0x4d   :  { %s1935_s28 = scalar_lea.vmem %s76_s21, 1024  ;;  %p1940_p8 = scmp.lt.s32.totalorder %s76_s21, %s76_s21 }
  0x4e   :  { %p1936_p7 = scmp.ne.s32.totalorder %s76_s21, %s1935_s28  ;;  %p1941_p9 = scmp.lt.s32.totalorder %s1935_s28, %s1935_s28 }
  0x50   :  { %p1942_p10 = por %p1941_p9, %p1940_p8 }
  0x52   :  { %p1943_p11 = pnand %p1942_p10, %p1936_p7 }
  0x54   :  { %1946 = shalt.err (!%p1943_p11)
}
  0x55   :  { %81 = dma.hbm_to_vmem [thread:$0]  %s2171_s7, 1024, %s76_s21, [#allocation9], %s1981_s1, %s1981_s1, %s1982_s10  }
  0x56   :  { %1969 = dma.done.wait [#allocation3], 128  }
  0x57   :  { %1970 = vsyncadd [#allocation3], 4294967168 }
  0x58   :  { %1971 = dma.done.wait [#allocation6], 16384  }
  0x59   :  { %1972 = vsyncadd [#allocation6], 4294950912 }
  0x5a   :  { %1973 = dma.done.wait [#allocation9], 3072  }
  0x5b   :  { %1974 = vsyncadd [#allocation9], 4294964224  ;;  %v1619_v0 = vld [vmem:[#allocation5 + $0x4] ss:$16 sps:$4 sm:$0xff]   ;;  %v1621_v1 = vld [vmem:[#allocation5] ss:$16 sps:$4 sm:$0xff]  }
  0x5c   :  { %514 = vmatprep.subr.bf16.mxu0 %v1619_v0  ;;  %v1622_v2 = vld [vmem:[#allocation5 + $0x24] ss:$16 sps:$4 sm:$0xff]   ;;  %v1624_v3 = vld [vmem:[#allocation5 + $0x20] ss:$16 sps:$4 sm:$0xff]   ;;  %v1666_v14 = vld [vmem:[#allocation5 + $0xc] ss:$16 sps:$4 sm:$0xff]  }
  0x5d   :  { %515 = vmatpush1.bf16.msra.mxu0 %v1621_v1  ;;  %v1625_v4 = vld [vmem:[#allocation5 + $0x44] ss:$16 sps:$4 sm:$0xff]   ;;  %v1627_v5 = vld [vmem:[#allocation5 + $0x40] ss:$16 sps:$4 sm:$0xff]   ;;  %v1669_v16 = vld [vmem:[#allocation5 + $0x8] ss:$16 sps:$4 sm:$0xff]   ;;  %555 = vmatprep.subr.bf16.mxu1 %v1666_v14 }
  0x5e   :  { %516 = vmatprep.subr.bf16.mxu0 %v1622_v2  ;;  %v1628_v6 = vld [vmem:[#allocation5 + $0x64] ss:$16 sps:$4 sm:$0xff]   ;;  %v1630_v7 = vld [vmem:[#allocation5 + $0x60] ss:$16 sps:$4 sm:$0xff]   ;;  %v2114_v17 = vld [vmem:[#allocation2] sm:$0xff]  ;;  %556 = vmatpush1.bf16.msra.mxu1 %v1669_v16  ;;  %vm1989_vm0 = vmmov 0  }
  0x5f   :  { %v1631_v8 = vld [vmem:[#allocation5 + $0x84] ss:$16 sps:$4 sm:$0xff]   ;;  %v1633_v9 = vld [vmem:[#allocation5 + $0x80] ss:$16 sps:$4 sm:$0xff]   ;;  %v1393_v18 = vcombine.high %v2114_v17, %v2114_v17  ;;  %v1672_v19 = vld [vmem:[#allocation5 + $0x2c] ss:$16 sps:$4 sm:$0xff]   ;;  %v1392_v59 = vcombine.low %v2114_v17, %v2114_v17 }
  0x60   :  { %v1634_v10 = vld [vmem:[#allocation5 + $0xa4] ss:$16 sps:$4 sm:$0xff]   ;;  %v1636_v11 = vld [vmem:[#allocation5 + $0xa0] ss:$16 sps:$4 sm:$0xff]   ;;  %v1674_v20 = vld [vmem:[#allocation5 + $0x28] ss:$16 sps:$4 sm:$0xff]   ;;  %557 = vmatprep.subr.bf16.mxu1 %v1672_v19 }
  0x61   :  { %517 = vmatpush1.bf16.msra.mxu0 %v1624_v3  ;;  %v1637_v12 = vld [vmem:[#allocation5 + $0xc4] ss:$16 sps:$4 sm:$0xff]   ;;  %v1639_v13 = vld [vmem:[#allocation5 + $0xc0] ss:$16 sps:$4 sm:$0xff]   ;;  %546 = vmatprep.mubr.bf16.mxu0 %v1393_v18  ;;  %v1675_v21 = vld [vmem:[#allocation5 + $0x4c] ss:$16 sps:$4 sm:$0xff]  }
  0x62   :  { %518 = vmatprep.subr.bf16.mxu0 %v1625_v4  ;;  %v1640_v15 = vld [vmem:[#allocation5 + $0xe4] ss:$16 sps:$4 sm:$0xff]   ;;  %v1642_v22 = vld [vmem:[#allocation5 + $0xe0] ss:$16 sps:$4 sm:$0xff]   ;;  %587 = vmatprep.mubr.bf16.mxu1 %v1393_v18  ;;  %v1677_v24 = vld [vmem:[#allocation5 + $0x48] ss:$16 sps:$4 sm:$0xff]  }
  0x63   :  { %v1643_v23 = vld [vmem:[#allocation5 + $0x104] ss:$16 sps:$4 sm:$0xff]   ;;  %558 = vmatpush1.bf16.msra.mxu1 %v1674_v20  ;;  %v1678_v25 = vld [vmem:[#allocation5 + $0x6c] ss:$16 sps:$4 sm:$0xff]   ;;  %v1645_v26 = vld [vmem:[#allocation5 + $0x100] ss:$16 sps:$4 sm:$0xff]  }
  0x64   :  { %559 = vmatprep.subr.bf16.mxu1 %v1675_v21  ;;  %v1646_v27 = vld [vmem:[#allocation5 + $0x124] ss:$16 sps:$4 sm:$0xff]   ;;  %v1680_v28 = vld [vmem:[#allocation5 + $0x68] ss:$16 sps:$4 sm:$0xff]   ;;  %v1681_v29 = vld [vmem:[#allocation5 + $0x8c] ss:$16 sps:$4 sm:$0xff]  }
  0x65   :  { %519 = vmatpush1.bf16.msra.mxu0 %v1627_v5  ;;  %v1648_v30 = vld [vmem:[#allocation5 + $0x120] ss:$16 sps:$4 sm:$0xff]   ;;  %v1649_v31 = vld [vmem:[#allocation5 + $0x144] ss:$16 sps:$4 sm:$0xff]   ;;  %v1683_v32 = vld [vmem:[#allocation5 + $0x88] ss:$16 sps:$4 sm:$0xff]  }
  0x66   :  { %520 = vmatprep.subr.bf16.mxu0 %v1628_v6  ;;  %v1684_v33 = vld [vmem:[#allocation5 + $0xac] ss:$16 sps:$4 sm:$0xff]   ;;  %v1651_v34 = vld [vmem:[#allocation5 + $0x140] ss:$16 sps:$4 sm:$0xff]   ;;  %v1652_v35 = vld [vmem:[#allocation5 + $0x164] ss:$16 sps:$4 sm:$0xff]  }
  0x67   :  { %560 = vmatpush1.bf16.msra.mxu1 %v1677_v24  ;;  %v1686_v36 = vld [vmem:[#allocation5 + $0xa8] ss:$16 sps:$4 sm:$0xff]   ;;  %v1687_v37 = vld [vmem:[#allocation5 + $0xcc] ss:$16 sps:$4 sm:$0xff]   ;;  %v1654_v38 = vld [vmem:[#allocation5 + $0x160] ss:$16 sps:$4 sm:$0xff]  }
  0x68   :  { %561 = vmatprep.subr.bf16.mxu1 %v1678_v25  ;;  %v1655_v39 = vld [vmem:[#allocation5 + $0x184] ss:$16 sps:$4 sm:$0xff]   ;;  %v1689_v40 = vld [vmem:[#allocation5 + $0xc8] ss:$16 sps:$4 sm:$0xff]   ;;  %v1690_v41 = vld [vmem:[#allocation5 + $0xec] ss:$16 sps:$4 sm:$0xff]  }
  0x69   :  { %521 = vmatpush1.bf16.msra.mxu0 %v1630_v7  ;;  %v1657_v42 = vld [vmem:[#allocation5 + $0x180] ss:$16 sps:$4 sm:$0xff]   ;;  %v1658_v43 = vld [vmem:[#allocation5 + $0x1a4] ss:$16 sps:$4 sm:$0xff]   ;;  %v1692_v44 = vld [vmem:[#allocation5 + $0xe8] ss:$16 sps:$4 sm:$0xff]  }
  0x6a   :  { %522 = vmatprep.subr.bf16.mxu0 %v1631_v8  ;;  %v1693_v45 = vld [vmem:[#allocation5 + $0x10c] ss:$16 sps:$4 sm:$0xff]   ;;  %v1660_v46 = vld [vmem:[#allocation5 + $0x1a0] ss:$16 sps:$4 sm:$0xff]   ;;  %v1661_v47 = vld [vmem:[#allocation5 + $0x1c4] ss:$16 sps:$4 sm:$0xff]  }
  0x6b   :  { %562 = vmatpush1.bf16.msra.mxu1 %v1680_v28  ;;  %v1695_v48 = vld [vmem:[#allocation5 + $0x108] ss:$16 sps:$4 sm:$0xff]   ;;  %v1696_v49 = vld [vmem:[#allocation5 + $0x12c] ss:$16 sps:$4 sm:$0xff]   ;;  %v1663_v50 = vld [vmem:[#allocation5 + $0x1c0] ss:$16 sps:$4 sm:$0xff]  }
  0x6c   :  { %563 = vmatprep.subr.bf16.mxu1 %v1681_v29  ;;  %v1664_v51 = vld [vmem:[#allocation5 + $0x1e4] ss:$16 sps:$4 sm:$0xff]   ;;  %v1698_v52 = vld [vmem:[#allocation5 + $0x128] ss:$16 sps:$4 sm:$0xff]   ;;  %v1699_v53 = vld [vmem:[#allocation5 + $0x14c] ss:$16 sps:$4 sm:$0xff]  }
  0x6d   :  { %523 = vmatpush1.bf16.msra.mxu0 %v1633_v9  ;;  %v1668_v54 = vld [vmem:[#allocation5 + $0x1e0] ss:$16 sps:$4 sm:$0xff]   ;;  %v1701_v55 = vld [vmem:[#allocation5 + $0x148] ss:$16 sps:$4 sm:$0xff]   ;;  %v1719_v56 = vld [vmem:[#allocation7 + $0x4] ss:$8 sps:$4 sm:$0xff]  }
  0x6e   :  { %524 = vmatprep.subr.bf16.mxu0 %v1634_v10  ;;  %v1702_v57 = vld [vmem:[#allocation5 + $0x16c] ss:$16 sps:$4 sm:$0xff]   ;;  %v1717_v58 = vld [vmem:[#allocation7] ss:$8 sps:$4 sm:$0xff]   ;;  %v1720_v63 = vld [vmem:[#allocation7 + $0x10] ss:$8 sps:$4 sm:$0xff]  }
  0x6f   :  { %564 = vmatpush1.bf16.msra.mxu1 %v1683_v32  ;;  %v1704_v60 = vld [vmem:[#allocation5 + $0x168] ss:$16 sps:$4 sm:$0xff]   ;;  %v1722_v61 = vld [vmem:[#allocation7 + $0x14] ss:$8 sps:$4 sm:$0xff]   ;;  %v1725_v1 = vld [vmem:[#allocation7 + $0x24] ss:$8 sps:$4 sm:$0xff]  }
  0x70   :  { %565 = vmatprep.subr.bf16.mxu1 %v1684_v33  ;;  %v1705_v62 = vld [vmem:[#allocation5 + $0x18c] ss:$16 sps:$4 sm:$0xff]   ;;  %v1707_v0 = vld [vmem:[#allocation5 + $0x188] ss:$16 sps:$4 sm:$0xff]   ;;  %s1990_s12 = smov [#allocation11]  }
  0x71   :  { %525 = vmatpush1.bf16.msra.mxu0 %v1636_v11  ;;  %v1708_v2 = vld [vmem:[#allocation5 + $0x1ac] ss:$16 sps:$4 sm:$0xff]   ;;  %v1723_v3 = vld [vmem:[#allocation7 + $0x20] ss:$8 sps:$4 sm:$0xff]   ;;  %v1726_v7 = vld [vmem:[#allocation7 + $0x30] ss:$8 sps:$4 sm:$0xff]  }
  0x72   :  { %526 = vmatprep.subr.bf16.mxu0 %v1637_v12  ;;  %v1710_v4 = vld [vmem:[#allocation5 + $0x1a8] ss:$16 sps:$4 sm:$0xff]   ;;  %v1728_v5 = vld [vmem:[#allocation7 + $0x34] ss:$8 sps:$4 sm:$0xff]   ;;  %v1731_v9 = vld [vmem:[#allocation7 + $0x44] ss:$8 sps:$4 sm:$0xff]  }
  0x73   :  { %566 = vmatpush1.bf16.msra.mxu1 %v1686_v36  ;;  %v1711_v6 = vld [vmem:[#allocation5 + $0x1cc] ss:$16 sps:$4 sm:$0xff]   ;;  %v1713_v8 = vld [vmem:[#allocation5 + $0x1c8] ss:$16 sps:$4 sm:$0xff]   ;;  %v1813_v36 = vld [vmem:[#allocation8 + $0x40] sm:$0xff]   ;;  %s1381_s13 = sshll.u32 %s1990_s12, 4  ;;  %s1382_s13 = int_to_ptr.vmem [resolvable:$true] %s1381_s13 }
  0x74   :  { %567 = vmatprep.subr.bf16.mxu1 %v1687_v37  ;;  %v1714_v10 = vld [vmem:[#allocation5 + $0x1ec] ss:$16 sps:$4 sm:$0xff]   ;;  %v1729_v11 = vld [vmem:[#allocation7 + $0x40] ss:$8 sps:$4 sm:$0xff]   ;;  %v1732_v14 = vld [vmem:[#allocation7 + $0x50] ss:$8 sps:$4 sm:$0xff]   ;;  %p1952_p13 = scmp.lt.s32.totalorder %s1382_s13, %s1382_s13 }
  0x75   :  { %527 = vmatpush1.bf16.msra.mxu0 %v1639_v13  ;;  %v1716_v12 = vld [vmem:[#allocation5 + $0x1e8] ss:$16 sps:$4 sm:$0xff]   ;;  %v1734_v13 = vld [vmem:[#allocation7 + $0x54] ss:$8 sps:$4 sm:$0xff]   ;;  %v1743_v19 = vld [vmem:[#allocation7 + $0x84] ss:$8 sps:$4 sm:$0xff]  }
  0x76   :  { %528 = vmatprep.subr.bf16.mxu0 %v1640_v15  ;;  %v1737_v15 = vld [vmem:[#allocation7 + $0x64] ss:$8 sps:$4 sm:$0xff]   ;;  %v1735_v16 = vld [vmem:[#allocation7 + $0x60] ss:$8 sps:$4 sm:$0xff]   ;;  %v1740_v17 = vld [vmem:[#allocation7 + $0x74] ss:$8 sps:$4 sm:$0xff]  }
  0x77   :  { %568 = vmatpush1.bf16.msra.mxu1 %v1689_v40  ;;  %v1738_v18 = vld [vmem:[#allocation7 + $0x70] ss:$8 sps:$4 sm:$0xff]   ;;  %v1741_v20 = vld [vmem:[#allocation7 + $0x80] ss:$8 sps:$4 sm:$0xff]   ;;  %v1746_v21 = vld [vmem:[#allocation7 + $0x94] ss:$8 sps:$4 sm:$0xff]  }
  0x78   :  { %569 = vmatprep.subr.bf16.mxu1 %v1690_v41  ;;  %v1747_v24 = vld [vmem:[#allocation7 + $0xa0] ss:$8 sps:$4 sm:$0xff]   ;;  %v1752_v25 = vld [vmem:[#allocation7 + $0xb4] ss:$8 sps:$4 sm:$0xff]  }
  0x79   :  { %529 = vmatpush1.bf16.msra.mxu0 %v1642_v22  ;;  %v1744_v22 = vld [vmem:[#allocation7 + $0x90] ss:$8 sps:$4 sm:$0xff]   ;;  %v1753_v28 = vld [vmem:[#allocation7 + $0xc0] ss:$8 sps:$4 sm:$0xff]   ;;  %v1758_v29 = vld [vmem:[#allocation7 + $0xd4] ss:$8 sps:$4 sm:$0xff]  }
  0x7a   :  { %530 = vmatprep.subr.bf16.mxu0 %v1643_v23  ;;  %v1749_v23 = vld [vmem:[#allocation7 + $0xa4] ss:$8 sps:$4 sm:$0xff]   ;;  %v1759_v32 = vld [vmem:[#allocation7 + $0xe0] ss:$8 sps:$4 sm:$0xff]   ;;  %v1764_v33 = vld [vmem:[#allocation7 + $0xf4] ss:$8 sps:$4 sm:$0xff]  }
  0x7b   :  { %570 = vmatpush1.bf16.msra.mxu1 %v1692_v44  ;;  %v1814_v37 = vld [vmem:[#allocation8] sm:$0xff]   ;;  %v1817_v40 = vld [vmem:[#allocation8 + $0x50] sm:$0xff]  }
  0x7c   :  { %571 = vmatprep.subr.bf16.mxu1 %v1693_v45  ;;  %v1818_v41 = vld [vmem:[#allocation8 + $0x10] sm:$0xff]   ;;  %v1821_v44 = vld [vmem:[#allocation8 + $0x60] sm:$0xff]  }
  0x7d   :  { %531 = vmatpush1.bf16.msra.mxu0 %v1645_v26  ;;  %v1750_v26 = vld [vmem:[#allocation7 + $0xb0] ss:$8 sps:$4 sm:$0xff]   ;;  %v1822_v45 = vld [vmem:[#allocation8 + $0x20] sm:$0xff]  }
  0x7e   :  { %532 = vmatprep.subr.bf16.mxu0 %v1646_v27  ;;  %v1755_v27 = vld [vmem:[#allocation7 + $0xc4] ss:$8 sps:$4 sm:$0xff]  }
  0x7f   :  { %572 = vmatpush1.bf16.msra.mxu1 %v1695_v48  ;;  %v167_v48 = vlaneseq }
  0x80   :  { %573 = vmatprep.subr.bf16.mxu1 %v1696_v49 }
  0x81   :  { %533 = vmatpush1.bf16.msra.mxu0 %v1648_v30  ;;  %v1756_v30 = vld [vmem:[#allocation7 + $0xd0] ss:$8 sps:$4 sm:$0xff]   ;;  %v2120_v49 = vshrl.u32 %v167_v48, 7 }
  0x82   :  { %534 = vmatprep.subr.bf16.mxu0 %v1649_v31  ;;  %v1761_v31 = vld [vmem:[#allocation7 + $0xe4] ss:$8 sps:$4 sm:$0xff]   ;;  %v1827_v48 = vld [vmem:[#allocation8 + $0x78] sm:$0xff]  }
  0x83   :  { %574 = vmatpush1.bf16.msra.mxu1 %v1698_v52  ;;  %v173_v52 = vsub.s32 1, %v2120_v49 }
  0x84   :  { %575 = vmatprep.subr.bf16.mxu1 %v1699_v53 }
  0x85   :  { %535 = vmatpush1.bf16.msra.mxu0 %v1651_v34  ;;  %v1762_v34 = vld [vmem:[#allocation7 + $0xf0] ss:$8 sps:$4 sm:$0xff]  }
  0x86   :  { %536 = vmatprep.subr.bf16.mxu0 %v1652_v35  ;;  %v1767_v35 = vld [vmem:[#allocation7 + $0x104] ss:$8 sps:$4 sm:$0xff]  }
  0x87   :  { %576 = vmatpush1.bf16.msra.mxu1 %v1701_v55 }
  0x88   :  { %577 = vmatprep.subr.bf16.mxu1 %v1702_v57 }
  0x89   :  { %537 = vmatpush1.bf16.msra.mxu0 %v1654_v38  ;;  %v1815_v38 = vld [vmem:[#allocation8 + $0x48] sm:$0xff]  }
  0x8a   :  { %538 = vmatprep.subr.bf16.mxu0 %v1655_v39  ;;  %v1816_v39 = vld [vmem:[#allocation8 + $0x8] sm:$0xff]  }
  0x8b   :  { %578 = vmatpush1.bf16.msra.mxu1 %v1704_v60 }
  0x8c   :  { %579 = vmatprep.subr.bf16.mxu1 %v1705_v62 }
  0x8d   :  { %539 = vmatpush1.bf16.msra.mxu0 %v1657_v42  ;;  %v1819_v42 = vld [vmem:[#allocation8 + $0x58] sm:$0xff]  }
  0x8e   :  { %540 = vmatprep.subr.bf16.mxu0 %v1658_v43  ;;  %v1820_v43 = vld [vmem:[#allocation8 + $0x18] sm:$0xff]  }
  0x8f   :  { %580 = vmatpush1.bf16.msra.mxu1 %v1707_v0  ;;  %v1765_v0 = vld [vmem:[#allocation7 + $0x100] ss:$8 sps:$4 sm:$0xff]  }
  0x90   :  { %581 = vmatprep.subr.bf16.mxu1 %v1708_v2  ;;  %v1770_v2 = vld [vmem:[#allocation7 + $0x114] ss:$8 sps:$4 sm:$0xff]  }
  0x91   :  { %541 = vmatpush1.bf16.msra.mxu0 %v1660_v46  ;;  %v1823_v46 = vld [vmem:[#allocation8 + $0x68] sm:$0xff]  }
  0x92   :  { %542 = vmatprep.subr.bf16.mxu0 %v1661_v47  ;;  %v1824_v47 = vld [vmem:[#allocation8 + $0x28] sm:$0xff]  }
  0x93   :  { %582 = vmatpush1.bf16.msra.mxu1 %v1710_v4  ;;  %v1773_v4 = vld [vmem:[#allocation7 + $0x124] ss:$8 sps:$4 sm:$0xff]  }
  0x94   :  { %583 = vmatprep.subr.bf16.mxu1 %v1711_v6  ;;  %v1776_v6 = vld [vmem:[#allocation7 + $0x134] ss:$8 sps:$4 sm:$0xff]  }
  0x95   :  { %543 = vmatpush1.bf16.msra.mxu0 %v1663_v50  ;;  %v169_v50 = vsub.s32 0, %v2120_v49 }
  0x96   :  { %544 = vmatprep.subr.bf16.mxu0 %v1664_v51  ;;  %v2126_v51 = vld [vmem:[%s2166_s2] sm:$0xf] }
  0x97   :  { %584 = vmatpush1.bf16.msra.mxu1 %v1713_v8  ;;  %v170_v53 = vrot.slane %v2126_v51, %v169_v50  ;;  %v1774_v8 = vld [vmem:[#allocation7 + $0x130] ss:$8 sps:$4 sm:$0xff]  }
  0x98   :  { %585 = vmatprep.subr.bf16.mxu1 %v1714_v10 }
  0x99   :  { %545 = vmatpush1.bf16.msra.mxu0 %v1668_v54  ;;  %v174_v54 = vrot.slane %v2126_v51, %v173_v52 }
  0x9a   :  { %1000 = vmatprep.subr.bf16.mxu0 %v1719_v56 }
  0x9b   :  { %586 = vmatpush1.bf16.msra.mxu1 %v1716_v12  ;;  %v1777_v12 = vld [vmem:[#allocation7 + $0x140] ss:$8 sps:$4 sm:$0xff]  }
  0x9c   :  { %547 = vmatmul.mubr.bf16.vlgmr.msra.gmra.mrb[0].mxu0 %v1392_v59  ;;  %1548 = vmatprep.subr.bf16.mxu1 %v1813_v36  ;;  %v1806_v36 = vld [vmem:[#allocation7 + $0x1d4] ss:$8 sps:$4 sm:$0xff]  }
  0x9d   :  { %1001 = vmatpush1.bf16.msra.mxu0 %v1717_v58 }
  0x9e   :  { %1002 = vmatprep.subr.bf16.mxu0 %v1722_v61  ;;  %588 = vmatmul.mubr.bf16.vlgmr.msra.gmra.mrb[0].mxu1 %v1392_v59 }
  0x9f   :  { %1549 = vmatpush3.bf16.msra.mxu1 %v1814_v37  ;;  %v1804_v37 = vld [vmem:[#allocation7 + $0x1d0] ss:$8 sps:$4 sm:$0xff]  }
  0xa0   :  { %1550 = vmatprep.subr.bf16.mxu1 %v1815_v38 }
  0xa1   :  { %1003 = vmatpush1.bf16.msra.mxu0 %v1720_v63 }
  0xa2   :  { %1004 = vmatprep.subr.bf16.mxu0 %v1725_v1 }
  0xa3   :  { %1551 = vmatpush3.bf16.msra.mxu1 %v1816_v39  ;;  %v1809_v39 = vld [vmem:[#allocation7 + $0x1e4] ss:$8 sps:$4 sm:$0xff]  }
  0xa4   :  { %1552 = vmatprep.subr.bf16.mxu1 %v1817_v40  ;;  %v1807_v40 = vld [vmem:[#allocation7 + $0x1e0] ss:$8 sps:$4 sm:$0xff]  }
  0xa5   :  { %1005 = vmatpush1.bf16.msra.mxu0 %v1723_v3  ;;  %v1768_v3 = vld [vmem:[#allocation7 + $0x110] ss:$8 sps:$4 sm:$0xff]  }
  0xa6   :  { %1006 = vmatprep.subr.bf16.mxu0 %v1728_v5  ;;  %v1771_v5 = vld [vmem:[#allocation7 + $0x120] ss:$8 sps:$4 sm:$0xff]  }
  0xa7   :  { %1553 = vmatpush3.bf16.msra.mxu1 %v1818_v41 }
  0xa8   :  { %1554 = vmatprep.subr.bf16.mxu1 %v1819_v42  ;;  %v1812_v42 = vld [vmem:[#allocation7 + $0x1f4] ss:$8 sps:$4 sm:$0xff]  }
  0xa9   :  { %1007 = vmatpush1.bf16.msra.mxu0 %v1726_v7  ;;  %v181_v7 = vsub.s32 3, %v2120_v49 }
  0xaa   :  { %1008 = vmatprep.subr.bf16.mxu0 %v1731_v9  ;;  %v1779_v9 = vld [vmem:[#allocation7 + $0x144] ss:$8 sps:$4 sm:$0xff]  }
  0xab   :  { %1555 = vmatpush3.bf16.msra.mxu1 %v1820_v43  ;;  %v182_v10 = vrot.slane %v2126_v51, %v181_v7  ;;  %v1810_v43 = vld [vmem:[#allocation7 + $0x1f0] ss:$8 sps:$4 sm:$0xff]  }
  0xac   :  { %1556 = vmatprep.subr.bf16.mxu1 %v1821_v44  ;;  %v1836_v7 = vld [vmem:[#allocation10 + $0x38] sm:$0xff]  }
  0xad   :  { %1009 = vmatpush1.bf16.msra.mxu0 %v1729_v11 }
  0xae   :  { %1010 = vmatprep.subr.bf16.mxu0 %v1734_v13 }
  0xaf   :  { %1557 = vmatpush3.bf16.msra.mxu1 %v1822_v45 }
  0xb0   :  { %1558 = vmatprep.subr.bf16.mxu1 %v1823_v46  ;;  %v1825_v46 = vld [vmem:[#allocation8 + $0x70] sm:$0xff]  }
  0xb1   :  { %1011 = vmatpush1.bf16.msra.mxu0 %v1732_v14  ;;  %v1782_v14 = vld [vmem:[#allocation7 + $0x154] ss:$8 sps:$4 sm:$0xff]  }
  0xb2   :  { %1012 = vmatprep.subr.bf16.mxu0 %v1737_v15 }
  0xb3   :  { %1559 = vmatpush3.bf16.msra.mxu1 %v1824_v47  ;;  %v1826_v47 = vld [vmem:[#allocation8 + $0x30] sm:$0xff]  }
  0xb4   :  { %1560 = vmatprep.subr.bf16.mxu1 %v1825_v46 }
  0xb5   :  { %1013 = vmatpush1.bf16.msra.mxu0 %v1735_v16 }
  0xb6   :  { %1014 = vmatprep.subr.bf16.mxu0 %v1740_v17 }
  0xb7   :  { %1561 = vmatpush3.bf16.msra.mxu1 %v1826_v47 }
  0xb8   :  { %1562 = vmatprep.subr.bf16.mxu1 %v1827_v48 }
  0xb9   :  { %1015 = vmatpush1.bf16.msra.mxu0 %v1738_v18 }
  0xba   :  { %1016 = vmatprep.subr.bf16.mxu0 %v1743_v19  ;;  %v1780_v19 = vld [vmem:[#allocation7 + $0x150] ss:$8 sps:$4 sm:$0xff]  }
  0xbd   :  { %1017 = vmatpush1.bf16.msra.mxu0 %v1741_v20  ;;  %v1785_v20 = vld [vmem:[#allocation7 + $0x164] ss:$8 sps:$4 sm:$0xff]  }
  0xbe   :  { %1018 = vmatprep.subr.bf16.mxu0 %v1746_v21 }
  0xc1   :  { %1019 = vmatpush1.bf16.msra.mxu0 %v1744_v22  ;;  %v1783_v22 = vld [vmem:[#allocation7 + $0x160] ss:$8 sps:$4 sm:$0xff]  }
  0xc2   :  { %1020 = vmatprep.subr.bf16.mxu0 %v1749_v23  ;;  %v1788_v23 = vld [vmem:[#allocation7 + $0x174] ss:$8 sps:$4 sm:$0xff]  }
  0xc5   :  { %1021 = vmatpush1.bf16.msra.mxu0 %v1747_v24  ;;  %v1786_v24 = vld [vmem:[#allocation7 + $0x170] ss:$8 sps:$4 sm:$0xff]  }
  0xc6   :  { %1022 = vmatprep.subr.bf16.mxu0 %v1752_v25  ;;  %v1791_v25 = vld [vmem:[#allocation7 + $0x184] ss:$8 sps:$4 sm:$0xff]  }
  0xc9   :  { %1023 = vmatpush1.bf16.msra.mxu0 %v1750_v26  ;;  %v1789_v26 = vld [vmem:[#allocation7 + $0x180] ss:$8 sps:$4 sm:$0xff]  }
  0xca   :  { %1024 = vmatprep.subr.bf16.mxu0 %v1755_v27  ;;  %v1794_v27 = vld [vmem:[#allocation7 + $0x194] ss:$8 sps:$4 sm:$0xff]  }
  0xcd   :  { %1025 = vmatpush1.bf16.msra.mxu0 %v1753_v28  ;;  %v1792_v28 = vld [vmem:[#allocation7 + $0x190] ss:$8 sps:$4 sm:$0xff]  }
  0xce   :  { %1026 = vmatprep.subr.bf16.mxu0 %v1758_v29  ;;  %v1797_v29 = vld [vmem:[#allocation7 + $0x1a4] ss:$8 sps:$4 sm:$0xff]  }
  0xd1   :  { %1027 = vmatpush1.bf16.msra.mxu0 %v1756_v30  ;;  %v1795_v30 = vld [vmem:[#allocation7 + $0x1a0] ss:$8 sps:$4 sm:$0xff]  }
  0xd2   :  { %1028 = vmatprep.subr.bf16.mxu0 %v1761_v31  ;;  %v1800_v31 = vld [vmem:[#allocation7 + $0x1b4] ss:$8 sps:$4 sm:$0xff]  }
  0xd5   :  { %1029 = vmatpush1.bf16.msra.mxu0 %v1759_v32  ;;  %v1798_v32 = vld [vmem:[#allocation7 + $0x1b0] ss:$8 sps:$4 sm:$0xff]  }
  0xd6   :  { %1030 = vmatprep.subr.bf16.mxu0 %v1764_v33  ;;  %v1803_v33 = vld [vmem:[#allocation7 + $0x1c4] ss:$8 sps:$4 sm:$0xff]  }
  0xd9   :  { %1031 = vmatpush1.bf16.msra.mxu0 %v1762_v34  ;;  %v1801_v34 = vld [vmem:[#allocation7 + $0x1c0] ss:$8 sps:$4 sm:$0xff]  }
  0xda   :  { %1041 = vmatprep.subr.bf16.mxu0 %v1767_v35  ;;  %v177_v35 = vsub.s32 2, %v2120_v49  ;;  %v1832_v49 = vld [vmem:[#allocation10 + $0x18] sm:$0xff]  }
  0xdc   :  { %v178_v38 = vrot.slane %v2126_v51, %v177_v35  ;;  %v1828_v51 = vld [vmem:[#allocation8 + $0x38] sm:$0xff]  }
  0xdd   :  { %1563 = vmatpush3.bf16.msra.mxu1 %v1828_v51 }
 0x16f   :  { %v548_v55 = vpop.f32.mrb[0].mxu0 }
 0x170   :  { %v549_v56 = vadd.f32 %v548_v55, %v170_v53  ;;  %v550_v57 = vpop.f32.mrb[1].mxu0  ;;  %v1988_v53 = vmov 0.0  }
 0x171   :  { %v551_v58 = vadd.f32 %v550_v57, %v174_v54  ;;  %v552_v59 = vpop.f32.mrb[2].mxu0  ;;  %v589_v11 = vpop.f32.mrb[0].mxu1  ;;  %1579 = vmatprep.subr.bf16.mxu1 %v1988_v53  ;;  %v668_v54 = vld [vmem:[%s2168_s4] sm:$0x3] }
 0x172   :  { %v596_v60 = vmax.f32 %v549_v56, 0.0  ;;  %v553_v61 = vpop.f32.mrb[3].mxu0  ;;  %v591_v13 = vpop.f32.mrb[1].mxu1  ;;  %v590_v41 = vadd.f32 %v589_v11, %v178_v38  ;;  %v673_v55 = vrot.slane %v668_v54, %v169_v50  ;;  %v677_v56 = vrot.slane %v668_v54, %v173_v52  ;;  %v1831_v50 = vld [vmem:[#allocation10 + $0x10] sm:$0xff]   ;;  %v1833_v52 = vld [vmem:[#allocation10 + $0x20] sm:$0xff]  }
 0x173   :  { %v597_v62 = vmax.f32 %v551_v58, 0.0  ;;  %v592_v15 = vadd.f32 %v591_v13, %v182_v10  ;;  %v593_v16 = vpop.f32.mrb[2].mxu1 }
 0x174   :  { %v600_v1 = vpack.c.bf16 %v596_v60, %v596_v60  ;;  %v594_v17 = vpop.f32.mrb[3].mxu1  ;;  %v598_v44 = vmax.f32 %v590_v41, 0.0 }
 0x175   :  { %v601_v63 = vpack.c.bf16 %v597_v62, %v597_v62  ;;  %v599_v18 = vmax.f32 %v592_v15, 0.0  ;;  %v1539_v17 = vld [vmem:[%s2172_s8] ss:$0 sm:$0xff] }
 0x176   :  { %v602_v45 = vpack.c.bf16 %v598_v44, %v598_v44 }
 0x177   :  { %1032 = vmatprep.mubr.bf16.mxu0 %v601_v63  ;;  %v603_v21 = vpack.c.bf16 %v599_v18, %v599_v18 }
 0x178   :  { %1033 = vmatmul.mubr.bf16.vlgmr.msra.gmra.mrb[4].mxu0 %v600_v1 }
 0x179   :  { %1042 = vmatpush1.bf16.msra.mxu0 %v1765_v0  ;;  %1073 = vmatprep.mubr.bf16.mxu0 %v603_v21 }
 0x17a   :  { %1043 = vmatprep.subr.bf16.mxu0 %v1770_v2  ;;  %v1829_v2 = vld [vmem:[#allocation10] sm:$0xff]  }
 0x17d   :  { %1044 = vmatpush1.bf16.msra.mxu0 %v1768_v3 }
 0x17e   :  { %1045 = vmatprep.subr.bf16.mxu0 %v1773_v4  ;;  %v1830_v4 = vld [vmem:[#allocation10 + $0x8] sm:$0xff]  }
 0x181   :  { %1046 = vmatpush1.bf16.msra.mxu0 %v1771_v5  ;;  %v1834_v5 = vld [vmem:[#allocation10 + $0x28] sm:$0xff]  }
 0x182   :  { %1047 = vmatprep.subr.bf16.mxu0 %v1776_v6  ;;  %v1835_v6 = vld [vmem:[#allocation10 + $0x30] sm:$0xff]  }
 0x185   :  { %1048 = vmatpush1.bf16.msra.mxu0 %v1774_v8 }
 0x186   :  { %1049 = vmatprep.subr.bf16.mxu0 %v1779_v9  ;;  %v1522_v9 = vld [vmem:[%s2170_s6] ss:$0 sm:$0xff]  ;;  %s1947_s6 = scalar_lea.vmem %s1382_s13, 128 }
 0x187   :  { %p1948_p12 = scmp.ne.s32.totalorder %s1382_s13, %s1947_s6  ;;  %p1953_p0 = scmp.lt.s32.totalorder %s1947_s6, %s1947_s6 }
 0x189   :  { %1050 = vmatpush1.bf16.msra.mxu0 %v1777_v12  ;;  %p1954_p1 = por %p1953_p0, %p1952_p13 }
 0x18a   :  { %1051 = vmatprep.subr.bf16.mxu0 %v1782_v14 }
 0x18b   :  { %p1955_p2 = pnand %p1954_p1, %p1948_p12 }
 0x18d   :  { %1052 = vmatpush1.bf16.msra.mxu0 %v1780_v19 }
 0x18e   :  { %1053 = vmatprep.subr.bf16.mxu0 %v1785_v20 }
 0x191   :  { %1054 = vmatpush1.bf16.msra.mxu0 %v1783_v22 }
 0x192   :  { %1055 = vmatprep.subr.bf16.mxu0 %v1788_v23 }
 0x195   :  { %1056 = vmatpush1.bf16.msra.mxu0 %v1786_v24 }
 0x196   :  { %1057 = vmatprep.subr.bf16.mxu0 %v1791_v25 }
 0x199   :  { %1058 = vmatpush1.bf16.msra.mxu0 %v1789_v26 }
 0x19a   :  { %1059 = vmatprep.subr.bf16.mxu0 %v1794_v27 }
 0x19d   :  { %1060 = vmatpush1.bf16.msra.mxu0 %v1792_v28 }
 0x19e   :  { %1061 = vmatprep.subr.bf16.mxu0 %v1797_v29 }
 0x1a1   :  { %1062 = vmatpush1.bf16.msra.mxu0 %v1795_v30 }
 0x1a2   :  { %1063 = vmatprep.subr.bf16.mxu0 %v1800_v31 }
 0x1a5   :  { %1064 = vmatpush1.bf16.msra.mxu0 %v1798_v32 }
 0x1a6   :  { %1065 = vmatprep.subr.bf16.mxu0 %v1803_v33 }
 0x1a9   :  { %1066 = vmatpush1.bf16.msra.mxu0 %v1801_v34 }
 0x1aa   :  { %1067 = vmatprep.subr.bf16.mxu0 %v1806_v36 }
 0x1ad   :  { %1068 = vmatpush1.bf16.msra.mxu0 %v1804_v37 }
 0x1ae   :  { %1069 = vmatprep.subr.bf16.mxu0 %v1809_v39 }
 0x1b1   :  { %1070 = vmatpush1.bf16.msra.mxu0 %v1807_v40 }
 0x1b2   :  { %1071 = vmatprep.subr.bf16.mxu0 %v1812_v42 }
 0x1b5   :  { %1072 = vmatpush1.bf16.msra.mxu0 %v1810_v43 }
 0x1b8   :  { %1074 = vmatmul.mubr.bf16.vlgmr.msra.gmra.mrb[4].mxu0 %v602_v45 }
 0x28b   :  { %v1075_v57 = vpop.f32.mrb[4].mxu0 }
 0x28c   :  { %v1599_v58 = vadd.f32 %v1075_v57, %v673_v55  ;;  %v1077_v59 = vpop.f32.mrb[5].mxu0 }
 0x28d   :  { %v1600_v60 = vadd.f32 %v1077_v59, %v677_v56  ;;  %v1079_v61 = vpop.f32.mrb[6].mxu0 }
 0x28e   :  { %v1082_v62 = vmax.f32 %v1599_v58, 0.0  ;;  %v1080_v63 = vpop.f32.mrb[7].mxu0 }
 0x28f   :  { %v1083_v0 = vmax.f32 %v1600_v60, 0.0 }
 0x290   :  { %v1084_v3 = vpack.c.bf16 %v1082_v62, %v1082_v62 }
 0x291   :  { %v1085_v1 = vpack.c.bf16 %v1083_v0, %v1083_v0 }
 0x293   :  { %1253 = vmatprep.mubr.bf16.mxu1 %v1085_v1 }
 0x294   :  { %1254 = vmatmul.mubr.bf16.vlgmr.msra.gmra.mrb[4].mxu1 %v1084_v3 }
 0x295   :  { %1580 = vmatpush3.bf16.msra.mxu1 %v1829_v2  ;;  %1595 = vmatprep.mubr.msk.bf16.mxu1 %vm1989_vm0, %v1988_v53 }
 0x296   :  { %1581 = vmatprep.subr.bf16.mxu1 %v1988_v53 }
 0x299   :  { %1582 = vmatpush3.bf16.msra.mxu1 %v1830_v4 }
 0x29a   :  { %1583 = vmatprep.subr.bf16.mxu1 %v1988_v53 }
 0x29d   :  { %1584 = vmatpush3.bf16.msra.mxu1 %v1831_v50 }
 0x29e   :  { %1585 = vmatprep.subr.bf16.mxu1 %v1988_v53 }
 0x2a1   :  { %1586 = vmatpush3.bf16.msra.mxu1 %v1832_v49 }
 0x2a2   :  { %1587 = vmatprep.subr.bf16.mxu1 %v1988_v53 }
 0x2a5   :  { %1588 = vmatpush3.bf16.msra.mxu1 %v1833_v52 }
 0x2a6   :  { %1589 = vmatprep.subr.bf16.mxu1 %v1988_v53 }
 0x2a9   :  { %1590 = vmatpush3.bf16.msra.mxu1 %v1834_v5 }
 0x2aa   :  { %1591 = vmatprep.subr.bf16.mxu1 %v1988_v53 }
 0x2ad   :  { %1592 = vmatpush3.bf16.msra.mxu1 %v1835_v6 }
 0x2ae   :  { %1593 = vmatprep.subr.bf16.mxu1 %v1988_v53 }
 0x2b1   :  { %1594 = vmatpush3.bf16.msra.mxu1 %v1836_v7 }
 0x367   :  { %v1564_v8 = vpop.f32.mrb[4].mxu1 }
 0x368   :  { %v1565_v10 = vpop.f32.mrb[5].mxu1 }
 0x369   :  { %v1566_v11 = vadd.f32 %v1565_v10, %v1564_v8  ;;  %v1567_v12 = vpop.f32.mrb[6].mxu1 }
 0x36a   :  { %v1568_v13 = vpop.f32.mrb[7].mxu1 }
 0x36b   :  { %v1256_v14 = vadd.f32 %v1566_v11, %v1522_v9 }
 0x36d   :  { %v1261_v15 = vmax.f32 %v1256_v14, 0.0 }
 0x36f   :  { %v1262_v16 = vpack.c.bf16 %v1261_v15, %v1261_v15 }
 0x371   :  { %1596 = vmatmul.mubr.bf16.vlgmr.msra.gmra.mrb[8].mxu1 %v1262_v16 }
 0x444   :  { %v1368_v18 = vpop.f32.mrb[8].mxu1 }
 0x445   :  { %v1369_v19 = vadd.f32 %v1539_v17, %v1368_v18  ;;  %v1597_v20 = vpop.f32.mrb[9].mxu1 }
 0x446   :  { %v1371_v21 = vpop.f32.mrb[10].mxu1 }
 0x447   :  { %1374 = vst [vmem:[#allocation11] sm:$0xff] %v1369_v19  ;;  %v1598_v22 = vpop.f32.mrb[11].mxu1 }
 0x448   :  { %1958 = shalt.err (!%p1955_p2)
}
 0x449   :  { %s1959_s8 = scalar_lea.hbm %s2173_s9, 128 }
 0x44a   :  { %p1960_p3 = scmp.ne.s32.totalorder %s2173_s9, %s1959_s8  ;;  %p1963_p4 = scmp.lt.u32.totalorder %s1959_s8, %s2173_s9 }
 0x44c   :  { %p1965_p5 = pnand %p1963_p4, %p1960_p3 }
 0x44e   :  { %1968 = shalt.err (!%p1965_p5)
}
 0x44f   :  { %1384 = dma.vmem_to_hbm [thread:$0]  %s1382_s13, 128, %s2173_s9, [#allocation4]  }
 0x450   :  { %1975 = dma.done.wait [#allocation4], 128  }
 0x451   :  { %1976 = vsyncadd [#allocation4], 4294967168 }
 0x452   :  { %1388 = vsyncpa [#allocation3], 1 }
 0x453   :  { %1389 = vsyncpa [#allocation6], 1 }
 0x454   :  { %1390 = vsyncpa [#allocation9], 1 }
 0x455   :  { %1391 = vsyncpa [#allocation4], 1 }

</bundles_post_ra>
